<compile_context>
chip_gen: v7x
topology: tpu7x:2x2x1
jax: 0.10.0
libtpu: 0.0.40
codegen_flags: <defaults>
</compile_context>

<pallas_src>
import jax
import jax.numpy as jnp
from jax.experimental import pallas as pl
from jax.experimental.pallas import tpu as pltpu


def _round_up(x, m):
    return ((x + m - 1) // m) * m


def decoder_kernel(x_ref, w1_ref, b1_ref, w2_ref, b2_ref, out_ref):
    # fc1: [TB, L] @ [L, H] -> f32 [TB, H]  (MXU); bias + ReLU in f32 (VPU).
    h = jnp.dot(x_ref[...], w1_ref[...], preferred_element_type=jnp.float32)
    h = jnp.maximum(h + b1_ref[...], 0.0)
    # fc2: [TB, H] @ [H, O] -> f32 [TB, O]; cast h to weight dtype so the bf16 MXU
    # path is used when matmul inputs are bf16 (no-op for f32).
    o = jnp.dot(h.astype(w2_ref.dtype), w2_ref[...],
                preferred_element_type=jnp.float32)
    o = o + b2_ref[...]
    # sigmoid(o) = 0.5*tanh(0.5*o) + 0.5 : one EUP op per element, exact.
    out_ref[...] = (0.5 * jnp.tanh(0.5 * o) + 0.5).astype(out_ref.dtype)


def decoder_forward(x, w1_t, b1, w2_t, b2, *,
                    block_batch=2048,
                    matmul_dtype=jnp.bfloat16,
                    out_dtype=jnp.bfloat16,
                    vmem_budget_bytes=32 << 20):
    """x: [B, latent]; w1_t: [latent, 128]; b1: [1, 128];
       w2_t: [128, out_dim]; b2: [1, out_dim]  ->  [B, out_dim] (out_dtype)."""
    B, latent = x.shape
    hidden = w1_t.shape[1]
    out_dim = w2_t.shape[1]

    # --- Output columns: pad to a lane-dense multiple of 128 only when cheap. ---
    if out_dim % 128 == 0:
        out_cols = out_dim
    else:
        next_mult = _round_up(out_dim, 128)
        # Pad only when the extra writeback bytes are <~33%; otherwise keep the
        # full-dim (unpadded) out BlockSpec (legal: block dim == array dim).
        out_cols = next_mult if out_dim >= 0.75 * next_mult else out_dim
    if out_cols != out_dim:
        w2_t = jnp.pad(w2_t, ((0, 0), (0, out_cols - out_dim)))
        b2 = jnp.pad(b2, ((0, 0), (0, out_cols - out_dim)))

    in_bytes = jnp.dtype(matmul_dtype).itemsize
    out_bytes = jnp.dtype(out_dtype).itemsize

    # --- VMEM budget: resident weights (count x2 for pipelining buffers) plus
    #     double-buffered x / out batch tiles. ---
    weight_bytes = (2 * (latent * hidden + hidden * out_cols) * in_bytes
                    + 2 * (hidden + out_cols) * 4)           # biases stay f32
    per_row = 2 * (latent * in_bytes + out_cols * out_bytes)  # double-buffered
    avail = max(vmem_budget_bytes - weight_bytes, per_row * 8)
    tb_vmem_cap = max(8, ((avail // per_row) // 8) * 8)
    # TODO(synk): tile out_dim for very large output_dim where resident W2 no
    # longer fits the per-core VMEM budget.

    # --- Batch tile: balanced across grid steps, >=2 steps when B >= 16 (v7x
    #     megacore), multiple of 8 sublanes, capped by block_batch and VMEM. ---
    tb_cap = min(block_batch, tb_vmem_cap)
    if B >= 16:
        tb_cap = min(tb_cap, _round_up(pl.cdiv(B, 2), 8))
    tb_cap = max(8, (tb_cap // 8) * 8)
    n_steps = pl.cdiv(B, tb_cap)
    tb = _round_up(pl.cdiv(B, n_steps), 8)      # tb <= tb_cap, minimal padding
    b_padded = n_steps * tb

    # Matmul operands optionally bf16 (halves HBM read bytes); biases stay f32.
    x_c = x.astype(matmul_dtype)
    if b_padded != B:
        x_c = jnp.pad(x_c, ((0, b_padded - B), (0, 0)))
    w1_c = w1_t.astype(matmul_dtype)
    w2_c = w2_t.astype(matmul_dtype)
    b1_f = b1.astype(jnp.float32)
    b2_f = b2.astype(jnp.float32)

    flops = 2 * b_padded * (latent * hidden + hidden * out_cols)
    bytes_accessed = (b_padded * latent * in_bytes
                      + (latent * hidden + hidden * out_cols) * in_bytes
                      + (hidden + out_cols) * 4
                      + b_padded * out_cols * out_bytes)
    vmem_needed = weight_bytes + tb * per_row
    vmem_limit = int(min(max(vmem_needed + (8 << 20), 32 << 20), 56 << 20))

    out = pl.pallas_call(
        decoder_kernel,
        out_shape=jax.ShapeDtypeStruct((b_padded, out_cols), out_dtype),
        grid=(n_steps,),
        in_specs=[
            pl.BlockSpec((tb, latent), lambda i: (i, 0)),        # x: tiled over batch
            pl.BlockSpec((latent, hidden), lambda i: (0, 0)),    # W1: resident
            pl.BlockSpec((1, hidden), lambda i: (0, 0)),         # b1: resident
            pl.BlockSpec((hidden, out_cols), lambda i: (0, 0)),  # W2: resident
            pl.BlockSpec((1, out_cols), lambda i: (0, 0)),       # b2: resident
        ],
        out_specs=pl.BlockSpec((tb, out_cols), lambda i: (i, 0)),
        compiler_params=pltpu.CompilerParams(
            dimension_semantics=("parallel",),   # megacore sharding on v7x
            vmem_limit_bytes=vmem_limit,
        ),
        cost_estimate=pl.CostEstimate(
            flops=flops,
            transcendentals=b_padded * out_cols,   # one tanh per output element
            bytes_accessed=bytes_accessed,
        ),
    )(x_c, w1_c, b1_f, w2_c, b2_f)

    # Strip batch / output-column padding only if it was introduced (padded output
    # columns contain sigmoid(0)=0.5 garbage and must not leak to the caller).
    if b_padded != B or out_cols != out_dim:
        out = out[:B, :out_dim]
    return out


def init_decoder_params(key, latent_dim, output_dim, hidden=128):
    """Deterministic init mimicking nn.Linear's U(-1/sqrt(fan_in), 1/sqrt(fan_in))."""
    k1, k2, k3, k4 = jax.random.split(key, 4)
    bound1 = 1.0 / jnp.sqrt(latent_dim)
    bound2 = 1.0 / jnp.sqrt(hidden)
    # Stored already transposed: [in, out]
    w1_t = jax.random.uniform(k1, (latent_dim, hidden), jnp.float32, -bound1, bound1)
    b1 = jax.random.uniform(k2, (1, hidden), jnp.float32, -bound1, bound1)
    w2_t = jax.random.uniform(k3, (hidden, output_dim), jnp.float32, -bound2, bound2)
    b2 = jax.random.uniform(k4, (1, output_dim), jnp.float32, -bound2, bound2)
    return w1_t, b1, w2_t, b2


if __name__ == "__main__":
    latent_dim, output_dim = 32, 64

    key = jax.random.PRNGKey(0)
    kx, kp = jax.random.split(key)
    w1_t, b1, w2_t, b2 = init_decoder_params(kp, latent_dim, output_dim)

    def ref_fn(xin):
        return jax.nn.sigmoid(jnp.maximum(xin @ w1_t + b1, 0.0) @ w2_t + b2)

    # 1) Exact path: f32 matmuls + f32 output, small batch (no padding, 1 step).
    x8 = jax.random.normal(kx, (8, latent_dim), jnp.float32)
    out_f32 = jax.block_until_ready(
        decoder_forward(x8, w1_t, b1, w2_t, b2,
                        matmul_dtype=jnp.float32, out_dtype=jnp.float32))
    assert out_f32.shape == (8, output_dim)
    assert out_f32.dtype == jnp.float32
    assert jnp.allclose(out_f32, ref_fn(x8), atol=1e-5, rtol=1e-5), "f32 path mismatch"

    # 2) Default fast path: bf16 matmuls + bf16 output; batch chosen to exercise
    #    batch padding and the >=2-grid-step (megacore) split.
    x20 = jax.random.normal(jax.random.PRNGKey(1), (20, latent_dim), jnp.float32)
    out_bf16 = jax.block_until_ready(decoder_forward(x20, w1_t, b1, w2_t, b2))
    assert out_bf16.shape == (20, output_dim)
    assert out_bf16.dtype == jnp.bfloat16
    assert jnp.allclose(out_bf16.astype(jnp.float32), ref_fn(x20),
                        atol=3e-2, rtol=3e-2), "bf16 path mismatch"

    print("KERNEL_OK")
</pallas_src>

<mosaic_0001>
module attributes {stable_mosaic.version = 11 : i64} {
  func.func @decoder_kernel(%arg0: i32, %arg1: memref<8x32xf32, #tpu.memory_space<vmem>>, %arg2: memref<32x128xf32, #tpu.memory_space<vmem>>, %arg3: memref<1x128xf32, #tpu.memory_space<vmem>>, %arg4: memref<128x64xf32, #tpu.memory_space<vmem>>, %arg5: memref<1x64xf32, #tpu.memory_space<vmem>>, %arg6: memref<8x64xf32, #tpu.memory_space<vmem>>) attributes {dimension_semantics = [#tpu.dimension_semantics<parallel>], iteration_bounds = array<i64: 1>, scalar_prefetch = 0 : i64, scratch_operands = 0 : i64, tpu.core_type = #tpu.core_type<tc>, window_params = [{transform_indices = @transform_0, window_bounds = array<i64: 8, 32>}, {pipeline_mode = #tpu.pipeline_mode<synchronous>, transform_indices = @transform_1, window_bounds = array<i64: 32, 128>}, {pipeline_mode = #tpu.pipeline_mode<synchronous>, transform_indices = @transform_2, window_bounds = array<i64: 1, 128>}, {pipeline_mode = #tpu.pipeline_mode<synchronous>, transform_indices = @transform_3, window_bounds = array<i64: 128, 64>}, {pipeline_mode = #tpu.pipeline_mode<synchronous>, transform_indices = @transform_4, window_bounds = array<i64: 1, 64>}, {transform_indices = @transform_5, window_bounds = array<i64: 8, 64>}]} {
    %c0 = arith.constant 0 : index
    %c0_0 = arith.constant 0 : index
    %0 = vector.load %arg1[%c0, %c0_0] : memref<8x32xf32, #tpu.memory_space<vmem>>, vector<8x32xf32>
    %c0_1 = arith.constant 0 : index
    %c0_2 = arith.constant 0 : index
    %1 = vector.load %arg2[%c0_1, %c0_2] : memref<32x128xf32, #tpu.memory_space<vmem>>, vector<32x128xf32>
    %cst = arith.constant dense<0.000000e+00> : vector<8x128xf32>
    %2 = tpu.matmul %0, %1, %cst {dimension_numbers = #tpu.dot_dimension_numbers<[1], [0], [0], [1], [0, 0, 1, 1], [], []>} : vector<8x32xf32>, vector<32x128xf32>, vector<8x128xf32> -> vector<8x128xf32>
    %c0_3 = arith.constant 0 : index
    %c0_4 = arith.constant 0 : index
    %3 = vector.load %arg3[%c0_3, %c0_4] : memref<1x128xf32, #tpu.memory_space<vmem>>, vector<1x128xf32>
    %4 = vector.broadcast %3 : vector<1x128xf32> to vector<8x128xf32>
    %5 = arith.addf %2, %4 : vector<8x128xf32>
    %cst_5 = arith.constant 0.000000e+00 : f32
    %6 = vector.broadcast %cst_5 : f32 to vector<8x128xf32>
    %7 = arith.maximumf %5, %6 : vector<8x128xf32>
    %c0_6 = arith.constant 0 : index
    %c0_7 = arith.constant 0 : index
    %8 = vector.load %arg4[%c0_6, %c0_7] : memref<128x64xf32, #tpu.memory_space<vmem>>, vector<128x64xf32>
    %cst_8 = arith.constant dense<0.000000e+00> : vector<8x64xf32>
    %9 = tpu.matmul %7, %8, %cst_8 {dimension_numbers = #tpu.dot_dimension_numbers<[1], [0], [0], [1], [0, 0, 1, 1], [], []>} : vector<8x128xf32>, vector<128x64xf32>, vector<8x64xf32> -> vector<8x64xf32>
    %c0_9 = arith.constant 0 : index
    %c0_10 = arith.constant 0 : index
    %10 = vector.load %arg5[%c0_9, %c0_10] : memref<1x64xf32, #tpu.memory_space<vmem>>, vector<1x64xf32>
    %11 = vector.broadcast %10 : vector<1x64xf32> to vector<8x64xf32>
    %12 = arith.addf %9, %11 : vector<8x64xf32>
    %cst_11 = arith.constant 5.000000e-01 : f32
    %13 = vector.broadcast %cst_11 : f32 to vector<8x64xf32>
    %14 = arith.mulf %13, %12 : vector<8x64xf32>
    %15 = math.tanh %14 : vector<8x64xf32>
    %cst_12 = arith.constant 5.000000e-01 : f32
    %16 = vector.broadcast %cst_12 : f32 to vector<8x64xf32>
    %17 = arith.mulf %16, %15 : vector<8x64xf32>
    %cst_13 = arith.constant 5.000000e-01 : f32
    %18 = vector.broadcast %cst_13 : f32 to vector<8x64xf32>
    %19 = arith.addf %17, %18 : vector<8x64xf32>
    %c0_14 = arith.constant 0 : index
    %c0_15 = arith.constant 0 : index
    %20 = vector.load %arg6[%c0_14, %c0_15] : memref<8x64xf32, #tpu.memory_space<vmem>>, vector<8x64xf32>
    tpu.vector_store %arg6[%c0_14, %c0_15], %19 {strides = array<i32>} : memref<8x64xf32, #tpu.memory_space<vmem>>, vector<8x64xf32>,
    return
  }
  func.func @transform_0(%arg0: i32) -> (i32, i32) {
    %c0_i32 = arith.constant 0 : i32
    %c0_i32_0 = arith.constant 0 : i32
    return %arg0, %c0_i32 : i32, i32
  }
  func.func @transform_1(%arg0: i32) -> (i32, i32) {
    %c0_i32 = arith.constant 0 : i32
    %c0_i32_0 = arith.constant 0 : i32
    %c0_i32_1 = arith.constant 0 : i32
    return %c0_i32, %c0_i32_0 : i32, i32
  }
  func.func @transform_2(%arg0: i32) -> (i32, i32) {
    %c0_i32 = arith.constant 0 : i32
    %c0_i32_0 = arith.constant 0 : i32
    %c0_i32_1 = arith.constant 0 : i32
    return %c0_i32, %c0_i32_0 : i32, i32
  }
  func.func @transform_3(%arg0: i32) -> (i32, i32) {
    %c0_i32 = arith.constant 0 : i32
    %c0_i32_0 = arith.constant 0 : i32
    %c0_i32_1 = arith.constant 0 : i32
    return %c0_i32, %c0_i32_0 : i32, i32
  }
  func.func @transform_4(%arg0: i32) -> (i32, i32) {
    %c0_i32 = arith.constant 0 : i32
    %c0_i32_0 = arith.constant 0 : i32
    %c0_i32_1 = arith.constant 0 : i32
    return %c0_i32, %c0_i32_0 : i32, i32
  }
  func.func @transform_5(%arg0: i32) -> (i32, i32) {
    %c0_i32 = arith.constant 0 : i32
    %c0_i32_0 = arith.constant 0 : i32
    return %arg0, %c0_i32 : i32, i32
  }
}

</mosaic_0001>

<bundles_post_ra>
// kernel: tpu_custom_call.1
= control target key start
LH: loop header
LB: loop body
LE: loop exit
PB: predicated region body
PF: predicated region fallthrough
CT: control target
= control target key end

     0   :  { %v352_v3 = vmov 0.0|0.0   ;;  %vm353_vm0 = vmmov 0   ;;  %v354_v6 = vmov 0.0   ;;  %s467_s0 = inlined_call_operand.vmem [shape: f32[8,32], index: 0, kind: input, shape index: {}]   ;;  %s468_s1 = inlined_call_operand.vmem [shape: f32[32,128], index: 1, kind: input, shape index: {}]   ;;  %s469_s2 = inlined_call_operand.vmem [shape: f32[1,128], index: 2, kind: input, shape index: {}]   ;;  %s470_s3 = inlined_call_operand.vmem [shape: f32[128,64], index: 3, kind: input, shape index: {}]   ;;  %s471_s4 = inlined_call_operand.vmem [shape: f32[1,64], index: 4, kind: input, shape index: {}]   ;;  %s472_s5 = inlined_call_operand.hbm [shape: f32[8,64], index: 5, kind: output, shape index: {}]  }
   0x1   :  { %v22_v0 = vld [vmem:[%s468_s1] sm:$0xff]  ;;  %v23_v1 = vld [vmem:[%s468_s1 + $0x8] sm:$0xff]  ;;  %v24_v2 = vld [vmem:[%s468_s1 + $0x10] sm:$0xff]  ;;  %292 = vmatprep.subr.bf16.mxu0 %v352_v3  ;;  %254 = vmatprep.mubr.msk.f32.mxu0 %vm353_vm0, %v354_v6 }
   0x2   :  { %v293_v4 = vpack.c.bf16 %v23_v1, %v22_v0  ;;  %v25_v5 = vld [vmem:[%s468_s1 + $0x18] sm:$0xff]  ;;  %v108_v7 = vld [vmem:[%s470_s3] sm:$0xff]  ;;  %298 = vmatprep.subr.bf16.mxu1 %v352_v3  ;;  %v109_v8 = vld [vmem:[%s470_s3 + $0x8] sm:$0xff]  ;;  %289 = vmatprep.mubr.msk.f32.mxu1 %vm353_vm0, %v354_v6 }
   0x3   :  { %v110_v9 = vld [vmem:[%s470_s3 + $0x10] sm:$0xff]  ;;  %v111_v10 = vld [vmem:[%s470_s3 + $0x18] sm:$0xff]  ;;  %v296_v11 = vpack.c.bf16 %v25_v5, %v24_v2  ;;  %v299_v12 = vpack.c.bf16 %v109_v8, %v108_v7  ;;  %v112_v14 = vld [vmem:[%s470_s3 + $0x20] sm:$0xff] }
   0x4   :  { %294 = vmatpush3.bf16.msra.mxu0 %v293_v4  ;;  %v302_v13 = vpack.c.bf16 %v111_v10, %v110_v9  ;;  %v113_v15 = vld [vmem:[%s470_s3 + $0x28] sm:$0xff] }
   0x5   :  { %295 = vmatprep.subr.bf16.mxu0 %v352_v3  ;;  %300 = vmatpush3.bf16.msra.mxu1 %v299_v12 }
   0x6   :  { %301 = vmatprep.subr.bf16.mxu1 %v352_v3 }
   0x7   :  { %10 = vsyncpa [#allocation3], 0  ;;  %v21_v16 = vld [vmem:[%s467_s0] sm:$0xff]  ;;  %vm33_vm1 = vcmask 261120   ;;  %v305_v17 = vpack.c.bf16 %v113_v15, %v112_v14  ;;  %v114_v18 = vld [vmem:[%s470_s3 + $0x30] sm:$0xff]  ;;  %vm205_vm2 = vcmask 523264  }
   0x8   :  { %297 = vmatpush3.bf16.msra.mxu0 %v296_v11  ;;  %v115_v19 = vld [vmem:[%s470_s3 + $0x38] sm:$0xff]  ;;  %v116_v21 = vld [vmem:[%s470_s3 + $0x40] sm:$0xff]  ;;  %v117_v22 = vld [vmem:[%s470_s3 + $0x48] sm:$0xff] }
   0x9   :  { %303 = vmatpush3.bf16.msra.mxu1 %v302_v13  ;;  %v308_v20 = vpack.c.bf16 %v115_v19, %v114_v18  ;;  %v311_v23 = vpack.c.bf16 %v117_v22, %v116_v21  ;;  %v118_v24 = vld [vmem:[%s470_s3 + $0x50] sm:$0xff]  ;;  %v119_v25 = vld [vmem:[%s470_s3 + $0x58] sm:$0xff]  ;;  %v120_v27 = vld [vmem:[%s470_s3 + $0x60] sm:$0xff] }
   0xa   :  { %304 = vmatprep.subr.bf16.mxu1 %v352_v3  ;;  %v314_v26 = vpack.c.bf16 %v119_v25, %v118_v24  ;;  %v121_v28 = vld [vmem:[%s470_s3 + $0x68] sm:$0xff]  ;;  %v122_v30 = vld [vmem:[%s470_s3 + $0x70] sm:$0xff]  ;;  %v123_v31 = vld [vmem:[%s470_s3 + $0x78] sm:$0xff]  ;;  %s355_s3 = smov [#allocation2]  }
   0xb   :  { %255 = vmatmul.mubr.msk.f32.vlgmr.msra.gmra.mrb[0].mxu0 %vm33_vm1, %v21_v16  ;;  %v317_v29 = vpack.c.bf16 %v121_v28, %v120_v27  ;;  %v320_v32 = vpack.c.bf16 %v123_v31, %v122_v30  ;;  %v221_v33 = vld [vmem:[%s469_s2] ss:$0 sm:$0xff]  ;;  %s213_s11 = sshll.u32 %s355_s3, 4  ;;  %s214_s11 = int_to_ptr.vmem [resolvable:$true] %s213_s11 }
   0xc   :  { %v223_v38 = vld [vmem:[%s471_s4] ss:$0 sm:$0xff]  ;;  %s328_s2 = scalar_lea.vmem %s214_s11, 128  ;;  %p333_p1 = scmp.lt.s32.totalorder %s214_s11, %s214_s11 }
   0xd   :  { %306 = vmatpush3.bf16.msra.mxu1 %v305_v17  ;;  %p329_p0 = scmp.ne.s32.totalorder %s214_s11, %s328_s2  ;;  %p334_p2 = scmp.lt.s32.totalorder %s328_s2, %s328_s2 }
   0xe   :  { %307 = vmatprep.subr.bf16.mxu1 %v352_v3 }
   0xf   :  { %p335_p3 = por %p334_p2, %p333_p1 }
  0x11   :  { %309 = vmatpush3.bf16.msra.mxu1 %v308_v20  ;;  %p336_p4 = pnand %p335_p3, %p329_p0 }
  0x12   :  { %310 = vmatprep.subr.bf16.mxu1 %v352_v3 }
  0x15   :  { %312 = vmatpush3.bf16.msra.mxu1 %v311_v23 }
  0x16   :  { %313 = vmatprep.subr.bf16.mxu1 %v352_v3 }
  0x19   :  { %315 = vmatpush3.bf16.msra.mxu1 %v314_v26 }
  0x1a   :  { %316 = vmatprep.subr.bf16.mxu1 %v352_v3 }
  0x1d   :  { %318 = vmatpush3.bf16.msra.mxu1 %v317_v29 }
  0x1e   :  { %319 = vmatprep.subr.bf16.mxu1 %v352_v3 }
  0x21   :  { %321 = vmatpush3.bf16.msra.mxu1 %v320_v32 }
  0xde   :  { %v103_v34 = vpop.f32.mrb[0].mxu0 }
  0xdf   :  { %v104_v35 = vadd.f32 %v221_v33, %v103_v34  ;;  %v256_v36 = vpop.f32.mrb[1].mxu0 }
  0xe1   :  { %v107_v37 = vmax.f32 %v104_v35, 0.0 }
  0xe3   :  { %290 = vmatmul.mubr.f32.vlgmr.msra.gmra.mrb[0].mxu1 %v107_v37 }
 0x1b6   :  { %v197_v39 = vpop.f32.mrb[0].mxu1 }
 0x1b7   :  { %v198_v40 = vadd.f32 %v223_v38, %v197_v39  ;;  %v291_v41 = vpop.f32.mrb[1].mxu1 }
 0x1b9   :  { %v201_v42 = vmul.f32 0.5, %v198_v40 }
 0x1bb   :  { %326 = vtanh.f32 %v201_v42 }
 0x1c5   :  { %v327_v43 = vpop.eup %326 }
 0x1c6   :  { %v203_v44 = vmul.f32 0.5, %v327_v43 }
 0x1c8   :  { %v204_v45 = vadd.f32 0.5, %v203_v44 }
 0x1ca   :  { %206 = vst.msk [vmem:[#allocation2] sm:$0xff] %vm205_vm2, %v204_v45 }
 0x1cb   :  { %339 = shalt.err (!%p336_p4)
}
 0x1cc   :  { %s340_s13 = scalar_lea.hbm %s472_s5, 128 }
 0x1cd   :  { %p341_p5 = scmp.ne.s32.totalorder %s472_s5, %s340_s13  ;;  %p344_p6 = scmp.lt.u32.totalorder %s340_s13, %s472_s5 }
 0x1cf   :  { %p346_p7 = pnand %p344_p6, %p341_p5 }
 0x1d1   :  { %349 = shalt.err (!%p346_p7)
}
 0x1d2   :  { %216 = dma.vmem_to_hbm [thread:$0]  %s214_s11, 128, %s472_s5, [#allocation3]  }
 0x1d3   :  { %350 = dma.done.wait [#allocation3], 128  }
 0x1d4   :  { %351 = vsyncadd [#allocation3], 4294967168 }
 0x1d5   :  { %220 = vsyncpa [#allocation3], 1 }

</bundles_post_ra>
